<compile_context>
chip_gen: v7x
topology: tpu7x:2x2x1
jax: 0.10.0
libtpu: 0.0.40
codegen_flags: <defaults>
</compile_context>

<pallas_src>
import math

import jax
import jax.numpy as jnp
from jax import lax
from jax.experimental import pallas as pl
from jax.experimental.pallas import tpu as pltpu

_LANE = 128
_SUBLANE = 8
_INF_BITS = 0x7F800000  # bit pattern of float32 +inf (scores are non-negative)


def _subnet_kernel(j_ref, bits_ref, out_ref):
    """One grid step = one mask.

    j_ref   : SMEM (1,) int32   -- j = int((1 - sparsity) * numel)
    bits_ref: VMEM [R, 128] i32 -- |scores| bitcast to int32, +inf padded
    out_ref : VMEM [R, 128] f32 -- binary subnet mask
    """
    j = j_ref[0]
    bits = bits_ref[...]
    r, c = bits.shape
    n_pad = r * c

    idx = (lax.broadcasted_iota(jnp.int32, (r, c), 0) * c
           + lax.broadcasted_iota(jnp.int32, (r, c), 1))

    def search(n_iters, lo0, hi0, pred_fn):
        """Smallest v in [lo0, hi0] with pred_fn(v) True (hi0 if none)."""
        def body(_, carry):
            lo, hi = carry
            mid = lo + lax.div(hi - lo, jnp.int32(2))   # no int32 overflow
            p = pred_fn(mid)
            nlo = jnp.where(p, lo, mid + 1)
            nhi = jnp.where(p, mid, hi)
            live = lo < hi
            return jnp.where(live, nlo, lo), jnp.where(live, nhi, hi)
        lo, _ = lax.fori_loop(0, n_iters, body, (lo0, hi0))
        return lo

    # ---- stage 1: T = bit pattern of the j-th smallest score (ascending) ----
    t_bits = search(
        31, jnp.int32(0), jnp.int32(_INF_BITS),
        lambda v: jnp.sum((bits <= v).astype(jnp.int32)) >= j + 1)

    # ---- stage 2: stable tie-break by flattened index at the threshold ----
    count_lt = jnp.sum((bits < t_bits).astype(jnp.int32))
    need_ties = j - count_lt            # tied elements that must be zeroed
    tied = bits == t_bits

    idx_iters = max(1, (n_pad - 1).bit_length())
    i_cut = search(
        idx_iters, jnp.int32(0), jnp.int32(n_pad - 1),
        lambda v: jnp.sum((tied & (idx <= v)).astype(jnp.int32)) >= need_ties)
    i_cut = jnp.where(need_ties > 0, i_cut, jnp.int32(-1))

    # ---- emit: keep (=1) iff ascending-sort position >= j ----
    keep = (bits > t_bits) | (tied & (idx > i_cut))
    out_ref[...] = keep.astype(out_ref.dtype)


def adapter_subnet_forward(down_mask, up_mask, sparsity):
    """Returns (down_subnet, up_subnet) binary masks, matching AdapterSubnet.forward()."""
    in_sz, out_sz = down_mask.shape
    assert up_mask.shape == (out_sz, in_sz), "up_mask must be the transposed shape"
    n = in_sz * out_sz
    j = int((1 - sparsity) * n)          # exactly as in GetSubnet.forward

    # |.|, bitcast to int32 in the wrapper (hoisted out of the kernel), pad
    # with +inf bits (never sorts before a real element), reshape to a
    # lane/sublane-dense [R, 128] slab per mask.
    tile = _SUBLANE * _LANE
    n_pad = ((n + tile - 1) // tile) * tile
    r = n_pad // _LANE

    flat = jnp.stack([down_mask.reshape(-1), up_mask.reshape(-1)])
    bits = lax.bitcast_convert_type(jnp.abs(flat).astype(jnp.float32), jnp.int32)
    if n_pad != n:
        bits = jnp.concatenate(
            [bits, jnp.full((2, n_pad - n), _INF_BITS, dtype=jnp.int32)], axis=1)
    bits = bits.reshape(2, r, _LANE)

    j_arr = jnp.array([j], dtype=jnp.int32)

    # in + out blocks, double-buffered, whole mask resident per grid step.
    vmem_need = 2 * 2 * (r * _LANE * 4) + (2 << 20)
    passes = 31 + max(1, (n_pad - 1).bit_length()) + 4

    out = pl.pallas_call(
        _subnet_kernel,
        out_shape=jax.ShapeDtypeStruct((2, r, _LANE), jnp.float32),
        grid_spec=pltpu.PrefetchScalarGridSpec(
            num_scalar_prefetch=1,
            grid=(2,),
            in_specs=[pl.BlockSpec((None, r, _LANE), lambda m, j_ref: (m, 0, 0))],
            out_specs=pl.BlockSpec((None, r, _LANE), lambda m, j_ref: (m, 0, 0)),
        ),
        compiler_params=pltpu.CompilerParams(
            dimension_semantics=("parallel",),
            vmem_limit_bytes=min(max(vmem_need, 32 << 20), 64 << 20)),
        cost_estimate=pl.CostEstimate(
            flops=int(2 * passes * 2 * n_pad),
            transcendentals=0,
            bytes_accessed=int(2 * 2 * n_pad * 4)),
    )(j_arr, bits)

    flat_out = out.reshape(2, n_pad)[:, :n]
    down_sub = flat_out[0].reshape(in_sz, out_sz).astype(down_mask.dtype)
    up_sub = flat_out[1].reshape(out_sz, in_sz).astype(up_mask.dtype)
    return down_sub, up_sub


def _reference(down_mask, up_mask, sparsity):
    """Pure-JAX replica of GetSubnet.apply(scores.abs(), k) for correctness checks."""
    def get_subnet(mask, k):
        n = mask.size
        j = int((1 - k) * n)
        scores = jnp.abs(mask).reshape(-1)
        order = jnp.argsort(scores)                      # stable ascending
        out = jnp.zeros((n,), mask.dtype).at[order[j:]].set(1.0)
        return out.reshape(mask.shape)
    return get_subnet(down_mask, sparsity), get_subnet(up_mask, sparsity)


if __name__ == "__main__":
    # Shapes implied by the module: down_mask [input_size, output_size],
    # up_mask [output_size, input_size]; adapter-style bottleneck.
    input_size, output_size, sparsity = 32, 8, 0.5
    n = input_size * output_size
    j = int((1 - sparsity) * n)

    key = jax.random.PRNGKey(0)
    kd, ku = jax.random.split(key)
    # kaiming_uniform_(a=sqrt(5)) on a 2-D tensor -> U(-1/sqrt(fan_in), 1/sqrt(fan_in))
    bound_d = 1.0 / math.sqrt(output_size)
    bound_u = 1.0 / math.sqrt(input_size)
    down_mask = jax.random.uniform(kd, (input_size, output_size), jnp.float32,
                                   -bound_d, bound_d)
    up_mask = jax.random.uniform(ku, (output_size, input_size), jnp.float32,
                                 -bound_u, bound_u)

    down_sub, up_sub = adapter_subnet_forward(down_mask, up_mask, sparsity)
    down_sub = jax.block_until_ready(down_sub)
    up_sub = jax.block_until_ready(up_sub)

    d_ref, u_ref = _reference(down_mask, up_mask, sparsity)

    assert down_sub.shape == (input_size, output_size)
    assert up_sub.shape == (output_size, input_size)
    assert bool(jnp.array_equal(down_sub, d_ref)), "down subnet mismatch vs reference"
    assert bool(jnp.array_equal(up_sub, u_ref)), "up subnet mismatch vs reference"
    # masks are binary with exactly (numel - j) ones
    assert int(down_sub.sum()) == n - j
    assert int(up_sub.sum()) == n - j

    print("KERNEL_OK")
</pallas_src>

<mosaic_0001>
module attributes {stable_mosaic.version = 11 : i64} {
  func.func @_subnet_kernel(%arg0: i32, %arg1: memref<1xi32, #tpu.memory_space<smem>>, %arg2: memref<1x8x128xi32, #tpu.memory_space<vmem>>, %arg3: memref<1x8x128xf32, #tpu.memory_space<vmem>>) attributes {dimension_semantics = [#tpu.dimension_semantics<parallel>], iteration_bounds = array<i64: 2>, scalar_prefetch = 1 : i64, scratch_operands = 0 : i64, tpu.core_type = #tpu.core_type<tc>, window_params = [{transform_indices = @transform_0, window_bounds = array<i64: 1, 8, 128>}, {transform_indices = @transform_1, window_bounds = array<i64: 1, 8, 128>}]} {
    %c0 = arith.constant 0 : index
    %0 = memref.load %arg1[%c0] : memref<1xi32, #tpu.memory_space<smem>>
    %c0_0 = arith.constant 0 : index
    %c0_1 = arith.constant 0 : index
    %c0_2 = arith.constant 0 : index
    %1 = vector.load %arg2[%c0_0, %c0_1, %c0_2] : memref<1x8x128xi32, #tpu.memory_space<vmem>>, vector<1x8x128xi32>
    %2 = vector.shape_cast %1 : vector<1x8x128xi32> to vector<8x128xi32>
    %3 = tpu.iota {dimensions = array<i32: 0>} : vector<8x128xi32>
    %c128_i32 = arith.constant 128 : i32
    %4 = vector.broadcast %c128_i32 : i32 to vector<8x128xi32>
    %5 = arith.muli %3, %4 : vector<8x128xi32>
    %6 = tpu.iota {dimensions = array<i32: 1>} : vector<8x128xi32>
    %7 = arith.addi %5, %6 : vector<8x128xi32>
    %c0_i32 = arith.constant 0 : i32
    %c2139095040_i32 = arith.constant 2139095040 : i32
    %c0_i32_3 = arith.constant 0 : i32
    %c31_i32 = arith.constant 31 : i32
    %8 = arith.addi %c0_i32_3, %c31_i32 : i32
    %c1_i32 = arith.constant 1 : i32
    %9:2 = scf.for %arg4 = %c0_i32_3 to %8 step %c1_i32 iter_args(%arg5 = %c0_i32, %arg6 = %c2139095040_i32) -> (i32, i32)  : i32 {
      %35 = arith.subi %arg6, %arg5 : i32
      %c2_i32 = arith.constant 2 : i32
      %36 = arith.divsi %35, %c2_i32 : i32
      %37 = arith.addi %arg5, %36 : i32
      %38 = vector.broadcast %37 : i32 to vector<8x128xi32>
      %39 = arith.cmpi sle, %2, %38 : vector<8x128xi32>
      %40 = arith.extui %39 : vector<8x128xi1> to vector<8x128xi32>
      %41 = vector.shape_cast %40 : vector<8x128xi32> to vector<1x8x128xi32>
      %cst_11 = arith.constant dense<0> : vector<1xi32>
      %42 = vector.multi_reduction <add>, %41, %cst_11 [1, 2] : vector<1x8x128xi32> to vector<1xi32>
      %43 = vector.shape_cast %42 : vector<1xi32> to vector<1x1x1xi32>
      %44 = vector.extract %43[0, 0, 0] : i32 from vector<1x1x1xi32>
      %c1_i32_12 = arith.constant 1 : i32
      %45 = arith.addi %0, %c1_i32_12 : i32
      %46 = arith.cmpi sge, %44, %45 : i32
      %c1_i32_13 = arith.constant 1 : i32
      %47 = arith.addi %37, %c1_i32_13 : i32
      %48 = arith.select %46, %arg5, %47 : i32
      %49 = arith.select %46, %37, %arg6 : i32
      %50 = arith.cmpi slt, %arg5, %arg6 : i32
      %51 = arith.select %50, %48, %arg5 : i32
      %52 = arith.select %50, %49, %arg6 : i32
      scf.yield %51, %52 : i32, i32
    }
    %10 = vector.broadcast %9#0 : i32 to vector<8x128xi32>
    %11 = arith.cmpi slt, %2, %10 : vector<8x128xi32>
    %12 = arith.extui %11 : vector<8x128xi1> to vector<8x128xi32>
    %13 = vector.shape_cast %12 : vector<8x128xi32> to vector<1x8x128xi32>
    %cst = arith.constant dense<0> : vector<1xi32>
    %14 = vector.multi_reduction <add>, %13, %cst [1, 2] : vector<1x8x128xi32> to vector<1xi32>
    %15 = vector.shape_cast %14 : vector<1xi32> to vector<1x1x1xi32>
    %16 = vector.extract %15[0, 0, 0] : i32 from vector<1x1x1xi32>
    %17 = arith.subi %0, %16 : i32
    %18 = vector.broadcast %9#0 : i32 to vector<8x128xi32>
    %19 = arith.cmpi eq, %2, %18 : vector<8x128xi32>
    %c0_i32_4 = arith.constant 0 : i32
    %c1023_i32 = arith.constant 1023 : i32
    %c0_i32_5 = arith.constant 0 : i32
    %c10_i32 = arith.constant 10 : i32
    %20 = arith.addi %c0_i32_5, %c10_i32 : i32
    %c1_i32_6 = arith.constant 1 : i32
    %21:2 = scf.for %arg4 = %c0_i32_5 to %20 step %c1_i32_6 iter_args(%arg5 = %c0_i32_4, %arg6 = %c1023_i32) -> (i32, i32)  : i32 {
      %35 = arith.subi %arg6, %arg5 : i32
      %c2_i32 = arith.constant 2 : i32
      %36 = arith.divsi %35, %c2_i32 : i32
      %37 = arith.addi %arg5, %36 : i32
      %38 = vector.broadcast %37 : i32 to vector<8x128xi32>
      %39 = arith.cmpi sle, %7, %38 : vector<8x128xi32>
      %40 = arith.andi %19, %39 : vector<8x128xi1>
      %41 = arith.extui %40 : vector<8x128xi1> to vector<8x128xi32>
      %42 = vector.shape_cast %41 : vector<8x128xi32> to vector<1x8x128xi32>
      %cst_11 = arith.constant dense<0> : vector<1xi32>
      %43 = vector.multi_reduction <add>, %42, %cst_11 [1, 2] : vector<1x8x128xi32> to vector<1xi32>
      %44 = vector.shape_cast %43 : vector<1xi32> to vector<1x1x1xi32>
      %45 = vector.extract %44[0, 0, 0] : i32 from vector<1x1x1xi32>
      %46 = arith.cmpi sge, %45, %17 : i32
      %c1_i32_12 = arith.constant 1 : i32
      %47 = arith.addi %37, %c1_i32_12 : i32
      %48 = arith.select %46, %arg5, %47 : i32
      %49 = arith.select %46, %37, %arg6 : i32
      %50 = arith.cmpi slt, %arg5, %arg6 : i32
      %51 = arith.select %50, %48, %arg5 : i32
      %52 = arith.select %50, %49, %arg6 : i32
      scf.yield %51, %52 : i32, i32
    }
    %c0_i32_7 = arith.constant 0 : i32
    %22 = arith.cmpi sgt, %17, %c0_i32_7 : i32
    %c-1_i32 = arith.constant -1 : i32
    %23 = arith.select %22, %21#0, %c-1_i32 : i32
    %24 = vector.broadcast %9#0 : i32 to vector<8x128xi32>
    %25 = arith.cmpi sgt, %2, %24 : vector<8x128xi32>
    %26 = vector.broadcast %23 : i32 to vector<8x128xi32>
    %27 = arith.cmpi sgt, %7, %26 : vector<8x128xi32>
    %28 = arith.andi %19, %27 : vector<8x128xi1>
    %29 = arith.ori %25, %28 : vector<8x128xi1>
    %30 = arith.extui %29 : vector<8x128xi1> to vector<8x128xi32>
    %31 = arith.sitofp %30 : vector<8x128xi32> to vector<8x128xf32>
    %c0_8 = arith.constant 0 : index
    %c0_9 = arith.constant 0 : index
    %c0_10 = arith.constant 0 : index
    %32 = vector.load %arg3[%c0_8, %c0_9, %c0_10] : memref<1x8x128xf32, #tpu.memory_space<vmem>>, vector<1x8x128xf32>
    %33 = vector.shape_cast %32 : vector<1x8x128xf32> to vector<8x128xf32>
    %34 = vector.shape_cast %31 : vector<8x128xf32> to vector<1x8x128xf32>
    tpu.vector_store %arg3[%c0_8, %c0_9, %c0_10], %34 {strides = array<i32>} : memref<1x8x128xf32, #tpu.memory_space<vmem>>, vector<1x8x128xf32>,
    return
  }
  func.func @transform_0(%arg0: i32, %arg1: memref<1xi32, #tpu.memory_space<smem>>) -> (i32, i32, i32) {
    %c0_i32 = arith.constant 0 : i32
    %c0_i32_0 = arith.constant 0 : i32
    %c0_i32_1 = arith.constant 0 : i32
    return %arg0, %c0_i32, %c0_i32_0 : i32, i32, i32
  }
  func.func @transform_1(%arg0: i32, %arg1: memref<1xi32, #tpu.memory_space<smem>>) -> (i32, i32, i32) {
    %c0_i32 = arith.constant 0 : i32
    %c0_i32_0 = arith.constant 0 : i32
    %c0_i32_1 = arith.constant 0 : i32
    return %arg0, %c0_i32, %c0_i32_0 : i32, i32, i32
  }
}

</mosaic_0001>

<bundles_post_ra>
// kernel: tpu_custom_call.1
= control target key start
LH: loop header
LB: loop body
LE: loop exit
PB: predicated region body
PF: predicated region fallthrough
CT: control target
= control target key end

     0   :  { %s929_s0 = inlined_call_operand.<no memory space> [shape: s32[1], index: 0, kind: input, shape index: {}]   ;;  %s930_s1 = inlined_call_operand.hbm [shape: s32[2,8,128], index: 1, kind: input, shape index: {}]   ;;  %s931_s2 = inlined_call_operand.hbm [shape: f32[2,8,128], index: 2, kind: output, shape index: {}]  }
   0x1   :  { %7 = sst [smem:[#allocation3]] %s929_s0 }
   0x2   :  { %8 = vsyncpa [#allocation5], 0 }
   0x3   :  { %10 = vsyncpa [#allocation5 + $0x1], 0 }
   0x4   :  { %11 = vsyncpa [#allocation6], 0 }
   0x5   :  { %13 = vsyncpa [#allocation6 + $0x1], 0  ;;  %s663_s11 = smov 0   ;;  %s665_s12 = smov 0  }
   0x6   :  { %s667_s13 = smov 0   ;;  %s669_s14 = smov 0  }
   0x7 LB: > { %s684_s0 = sadd.s32 4294967295, %s613_s14   ;;  %s374_s15 = sadd.s32 4294967294, %s613_s14   ;;  %s613_s14 = sphi %s669_s14, %s950_s14   ;;  %s609_s13 = sphi %s667_s13, %s949_s13   ;;  %s605_s12 = sphi %s665_s12, %s948_s12   ;;  %s601_s11 = sphi %s663_s11, %s947_s11  }
   0x8   : > { %s688_s16 = sadd.s32 1, %s613_s14   ;;  %s26_s17 = sadd.s32 1, %s609_s13 }
   0x9   : > { %s23_s18 = ssub.s32 %s613_s14, %s688_s16  ;;  %p33_p0 = scmp.ne.s32.totalorder %s609_s13, %s605_s12 }
   0xa   : > { %p24_p1 = scmp.eq.s32.totalorder %s23_s18, 0  ;;  %p34_p2 = scmp.eq.s32.totalorder %s613_s14, 0 }
   0xb   : > { %p39_p3 = scmp.ne.s32.totalorder %s605_s12, %s601_s11  ;;  %p40_p4 = scmp.eq.s32.totalorder %s684_s0, 0 }
   0xc   : > { %s700_s19 = scalar_select %p24_p1, %s609_s13, %s26_s17  }
   0xd   : > { %p702_p5 = por %p34_p2, %p33_p0  ;;  %p706_p6 = por %p40_p4, %p39_p3 }
   0xe   : > { %p63_p7 = scmp.eq.s32.totalorder %s684_s0, 1  ;;  %p69_p8 = scmp.eq.s32.totalorder %s374_s15, 1 }
   0xf   : > { %p407_p10 = scmp.lt.s32.totalorder %s613_s14, 2  ;;  %s89_s24 = sand.u32 1, %s609_s13  }
  0x10   : > { %p713_p11 = por %p63_p7, %p33_p0  ;;  %p717_p12 = por %p69_p8, %p39_p3 }
  0x11   : > { %s378_s25 = sshll.u32 %s613_s14, 7  ;;  %s377_s26 = sshll.u32 %s89_s24, 3 }
  0x12   : > { %s935_s22 = scalar_select %p713_p11, 1, 0 }
  0x13   : > { %s936_s23 = scalar_select %p717_p12, 1, 0 }
  0x14   : > { %s726_s29 = scalar_lea.hbm %s930_s1, %s378_s25  ;;  %s93_s30 = scalar_lea.vmem [#allocation4], %s377_s26 }
  0x15   : > { %s100_s3 = sshll.u32 %s93_s30, 4  ;;  %p730_p13 = pnand %p407_p10, %p702_p5  ;;  %s734_s3 = int_to_ptr.vmem [resolvable:$true] %s100_s3 }
  0x16   : > { %s90_s5 = scalar_lea.sflag [#allocation5], %s89_s24  ;;  %s493_s6 = scalar_lea.hbm %s726_s29, 128 }
  0x17   : > { %p494_p2 = scmp.ne.s32.totalorder %s726_s29, %s493_s6  ;;  %p495_p3 = pneg %p730_p13 }
  0x18   : > { %s498_s9 = scalar_lea.hbm %s930_s1, 256  ;;  %p499_p5 = scmp.lt.u32.totalorder %s726_s29, %s930_s1 }
  0x19   : > { %p496_p4 = pnand %p495_p3, %p494_p2  ;;  %p500_p8 = scmp.lt.u32.totalorder %s498_s9, %s493_s6 }
  0x1a   : > { %p502_p9 = scmp.lt.u32.totalorder %s493_s6, %s726_s29 }
  0x1b   : > { %p497_p7 = pneg %p496_p4  ;;  %p501_p10 = por %p500_p8, %p499_p5 }
  0x1d   : > { %p503_p0 = por %p502_p9, %p501_p10 }
  0x1f   : > { %p504_p1 = pnand %p503_p0, %p497_p7 }
  0x21   : > { %507 = shalt.err (!%p504_p1)
}
  0x22   : > { %s508_s17 = scalar_lea.vmem %s734_s3, 128  ;;  %s639_s18 = smov [#allocation4]  }
  0x23   : > { %p509_p2 = scmp.ne.s32.totalorder %s734_s3, %s508_s17  ;;  %s513_s20 = sshll.u32 %s639_s18, 4  ;;  %s514_s20 = int_to_ptr.vmem [resolvable:$false] %s513_s20 }
  0x24   : > { %s515_s24 = scalar_lea.vmem %s514_s20, 256  ;;  %p516_p11 = scmp.lt.s32.totalorder %s734_s3, %s514_s20 }
  0x25   : > { %p511_p4 = pnand %p509_p2, %p495_p3  ;;  %p517_p5 = scmp.lt.s32.totalorder %s515_s24, %s508_s17 }
  0x27   : > { %p512_p12 = pneg %p511_p4  ;;  %p518_p8 = por %p517_p5, %p516_p11 }
  0x29   : > { %p519_p9 = pnand %p518_p8, %p512_p12 }
  0x2b   : > { %522 = shalt.err (!%p519_p9)
}
  0x2c   : > { %402 = dma.hbm_to_vmem [thread:$0]  (!%p730_p13), %s726_s29, 128, %s734_s3, %s90_s5  }
  0x2d   : > { %p938_p0 = scmp.lt.s32.totalorder %s613_s14, 3  ;;  %p939_p1 = scmp.ge.s32.totalorder %s613_s14, 1 }
  0x2f   : > { %p106_p3 = pnand %p939_p1, %p938_p0 }
  0x30   : > { %s768_s25 = sand.u32 (!%p106_p3), 1, %s605_s12  }
  0x31   : > { %109 = sbr.rel (%p106_p3) target bundleno = 771 (0x303), region = 24  ;;  %s380_s26 = sshll.u32 (!%p106_p3), %s768_s25, 3 }
  0x32   : > { %s112_s27 = scalar_lea.sflag (!%p106_p3), [#allocation5], %s768_s25  ;;  %s115_s28 = scalar_lea.vmem (!%p106_p3), [#allocation4], %s380_s26 }
  0x38   : > { %592 = dma.done.wait (%p706_p6), %s112_s27, 128  }
  0x39   : > { %594 = vsyncadd (%p706_p6), %s112_s27, 4294967168  ;;  %v136_v0 = vlaneseq  ;;  %s776_s29 = sld [smem:[#allocation3]]  ;;  %v780_v5 = vld [vmem:[%s115_s28] sm:$0xff]  ;;  %s782_s30 = scalar_lea.vmem [#allocation7], %s380_s26 }
  0x3a   : > { %s784_s3 = smov 2139095040   ;;  %s786_s4 = smov 0  }
  0x3b   : > { %v137_v1 = vshrl.u32 %v136_v0, 7  ;;  %v140_v2 = vand.u32 127, %v136_v0  ;;  %s788_s5 = smov 0  }
  0x3d   : > { %v138_v3 = vmul.u32 128, %v137_v1 }
  0x3f   : > { %v778_v4 = vadd.s32 %v140_v2, %v138_v3 }
  0x40 LB: >> { %s150_s21 = ssub.s32 %s617_s3, %s621_s4  ;;  %v640_v7 = vmov 0   ;;  %s180_s15 = sadd.s32 1, %s776_s29  ;;  %s625_s5 = sphi %s788_s5, %s147_s5   ;;  %s621_s4 = sphi %s786_s4, %s941_s4   ;;  %s617_s3 = sphi %s784_s3, %s940_s3  }
  0x41   : >> { %p151_p6 = scmp.lt.s32.totalorder %s150_s21, 0  ;;  %s152_s6 = ssub.s32 0, %s150_s21 }
  0x42   : >> { %s382_s7 = smin.u32 %s152_s6, %s150_s21  ;;  %p185_p12 = scmp.lt.s32.totalorder %s621_s4, %s617_s3 }
  0x43   : >> { %s154_s8 = sshrl.u32 %s382_s7, 1  ;;  %s147_s5 = sadd.s32 1, %s625_s5  }
  0x44   : >> { %s155_s9 = ssub.s32 0, %s154_s8  ;;  %p144_p13 = scmp.ge.s32.totalorder %s147_s5, 31  }
  0x45   : >> { %s952_s9 = smov (!%p151_p6, %s155_s9), %s154_s8  ;;  %v641_v26 = vmov (%p144_p13), 0   ;;  %s831_s27 = smov (%p144_p13), 1023  }
  0x46   : >> { %s802_s10 = sadd.s32 %s621_s4, %s952_s9  ;;  %s833_s28 = smov (%p144_p13), 0  }
  0x47   : >> { %v158_v6 = vstv %s802_s10  ;;  %s182_s18 = sadd.s32 1, %s802_s10 }
  0x48   : >> { %vm159_vm0 = vcmp.le.s32.totalorder %v780_v5, %v158_v6 }
  0x49   : >> { %v160_v8 = vsel %vm159_vm0, 1, %v640_v7 }
  0x4a   : >> { %v162_v9 = vshrl.u32 %v160_v8, 16  ;;  %v161_v10 = vand.u32 65535, %v160_v8 }
  0x4c   : >> { %v164_v11 = vcvt.s32.f32 %v162_v9  ;;  %v163_v12 = vcvt.s32.f32 %v161_v10 }
  0x4e   : >> { %167 = vadd.xlane.f32.xlu0 %v164_v11 }
  0x52   : >> { %165 = vadd.xlane.f32.xlu0 %v163_v12 }
  0xdb   : >> { %v168_v13 = vpop.xlane.xlu0 %167 }
  0xdc   : >> { %v170_v14 = vcvt.f32.s32 %v168_v13 }
  0xde   : >> { %v171_v16 = vshll.u32 %v170_v14, 16 }
  0xdf   : >> { %v166_v15 = vpop.xlane.xlu0 %165 }
  0xe0   : >> { %v169_v17 = vcvt.f32.s32 %v166_v15 }
  0xe2   : >> { %v172_v18 = vadd.s32 %v171_v16, %v169_v17 }
  0xe4   : >> { %v173_v19 = vrot.slane %v172_v18, 4 }
  0xe6   : >> { %v174_v20 = vadd.s32 %v173_v19, %v172_v18 }
  0xe8   : >> { %v175_v21 = vrot.slane %v174_v20, 2 }
  0xea   : >> { %v176_v22 = vadd.s32 %v175_v21, %v174_v20 }
  0xec   : >> { %v177_v23 = vrot.slane %v176_v22, 1 }
  0xee   : >> { %v178_v24 = vadd.s32 %v177_v23, %v176_v22 }
  0xf0   : >> { %389 = vpush %v178_v24 }
 0x121   : >> { %s390_s17 = spop %389  ;;  %146 = sbr.rel (!%p144_p13) target bundleno = 64 (0x40), region = 83 }
 0x122   : >> { %p181_p11 = scmp.ge.s32.totalorder %s390_s17, %s180_s15 }
 0x124   : >> { %s183_s20 = scalar_select %p181_p11, %s621_s4, %s182_s18 }
 0x125   : >> { %s954_s10 = smov (!%p181_p11, %s802_s10), %s617_s3 }
 0x126   : >> { %s956_s20 = smov (!%p185_p12, %s183_s20), %s621_s4  ;;  %s958_s10 = smov (!%p185_p12, %s954_s10), %s617_s3 }
 0x127   : >> { %s940_s3 = smov %s958_s10  ;;  %s941_s4 = smov %s956_s20  ;;  %v822_v25 = vstv (%p144_p13), %s956_s20 }
 0x128   : > { %vm189_vm1 = vcmp.lt.s32.totalorder %v780_v5, %v822_v25  ;;  %vm211_vm2 = vcmp.eq.s32.totalorder %v780_v5, %v822_v25  ;;  %s835_s3 = smov 0  }
 0x129   : > { %v190_v27 = vsel %vm189_vm1, 1, %v641_v26 }
 0x12a   : > { %v192_v28 = vshrl.u32 %v190_v27, 16  ;;  %v191_v29 = vand.u32 65535, %v190_v27 }
 0x12c   : > { %v194_v30 = vcvt.s32.f32 %v192_v28  ;;  %v193_v31 = vcvt.s32.f32 %v191_v29 }
 0x12e   : > { %197 = vadd.xlane.f32.xlu0 %v194_v30 }
 0x132   : > { %195 = vadd.xlane.f32.xlu0 %v193_v31 }
 0x1bb   : > { %v198_v32 = vpop.xlane.xlu0 %197 }
 0x1bc   : > { %v200_v33 = vcvt.f32.s32 %v198_v32 }
 0x1be   : > { %v201_v35 = vshll.u32 %v200_v33, 16 }
 0x1bf   : > { %v196_v34 = vpop.xlane.xlu0 %195 }
 0x1c0   : > { %v199_v36 = vcvt.f32.s32 %v196_v34 }
 0x1c2   : > { %v202_v37 = vadd.s32 %v201_v35, %v199_v36 }
 0x1c4   : > { %v203_v38 = vrot.slane %v202_v37, 4 }
 0x1c6   : > { %v204_v39 = vadd.s32 %v203_v38, %v202_v37 }
 0x1c8   : > { %v205_v40 = vrot.slane %v204_v39, 2 }
 0x1ca   : > { %v206_v41 = vadd.s32 %v205_v40, %v204_v39 }
 0x1cc   : > { %v207_v42 = vrot.slane %v206_v41, 1 }
 0x1ce   : > { %v208_v43 = vadd.s32 %v207_v42, %v206_v41 }
 0x1d0   : > { %391 = vpush %v208_v43 }
 0x201   : > { %s392_s24 = spop %391 }
 0x202   : > { %s829_s26 = ssub.s32 %s776_s29, %s392_s24 }
 0x203 LB: >> { %s220_s29 = ssub.s32 %s629_s27, %s633_s28  ;;  %v642_v45 = vmov 0   ;;  %p255_p2 = scmp.lt.s32.totalorder %s633_s28, %s629_s27  ;;  %s637_s3 = sphi %s835_s3, %s217_s3   ;;  %s633_s28 = sphi %s833_s28, %s943_s28   ;;  %s629_s27 = sphi %s831_s27, %s942_s27  }
 0x204   : >> { %p221_p7 = scmp.lt.s32.totalorder %s220_s29, 0  ;;  %s222_s4 = ssub.s32 0, %s220_s29 }
 0x205   : >> { %s383_s5 = smin.u32 %s222_s4, %s220_s29  ;;  %s217_s3 = sadd.s32 1, %s637_s3  }
 0x206   : >> { %s224_s21 = sshrl.u32 %s383_s5, 1  ;;  %p214_p4 = scmp.ge.s32.totalorder %s217_s3, 10  }
 0x207   : >> { %s225_s6 = ssub.s32 0, %s224_s21  ;;  %p258_p5 = scmp.gt.s32.totalorder (%p214_p4), %s829_s26, 0  ;;  %vm260_vm5 = vcmp.gt.s32.totalorder (%p214_p4), %v780_v5, %v822_v25  ;;  %v643_v0 = vmov (%p214_p4), 0.0  }
 0x208   : >> { %s960_s6 = smov (!%p221_p7, %s225_s6), %s224_s21  ;;  %s386_s15 = sshll.u32 (%p214_p4), %s684_s0, 7 }
 0x209   : >> { %s849_s7 = sadd.s32 %s633_s28, %s960_s6  ;;  %s282_s17 = sshll.u32 (%p214_p4), %s782_s30, 4  ;;  %s886_s17 = int_to_ptr.vmem [resolvable:$true] %s282_s17 }
 0x20a   : >> { %v228_v44 = vstv %s849_s7  ;;  %s252_s9 = sadd.s32 1, %s849_s7  ;;  %s884_s24 = scalar_lea.hbm (%p214_p4), %s931_s2, %s386_s15 }
 0x20b   : >> { %vm229_vm3 = vcmp.le.s32.totalorder %v778_v4, %v228_v44  ;;  %s269_s0 = scalar_lea.sflag (%p214_p4), [#allocation6], %s768_s25  ;;  %p944_p9 = scmp.ne.s32.totalorder (%p214_p4), %s935_s22, 0 }
 0x20c   : >> { %vm230_vm4 = vmand %vm211_vm2, %vm229_vm3 }
 0x20d   : >> { %v231_v46 = vsel %vm230_vm4, 1, %v642_v45 }
 0x20e   : >> { %v233_v47 = vshrl.u32 %v231_v46, 16  ;;  %v232_v48 = vand.u32 65535, %v231_v46 }
 0x210   : >> { %v235_v49 = vcvt.s32.f32 %v233_v47  ;;  %v234_v50 = vcvt.s32.f32 %v232_v48 }
 0x212   : >> { %238 = vadd.xlane.f32.xlu0 %v235_v49 }
 0x216   : >> { %236 = vadd.xlane.f32.xlu0 %v234_v50 }
 0x29f   : >> { %v239_v51 = vpop.xlane.xlu0 %238 }
 0x2a0   : >> { %v241_v52 = vcvt.f32.s32 %v239_v51 }
 0x2a2   : >> { %v242_v54 = vshll.u32 %v241_v52, 16 }
 0x2a3   : >> { %v237_v53 = vpop.xlane.xlu0 %236 }
 0x2a4   : >> { %v240_v55 = vcvt.f32.s32 %v237_v53 }
 0x2a6   : >> { %v243_v56 = vadd.s32 %v242_v54, %v240_v55 }
 0x2a8   : >> { %v244_v57 = vrot.slane %v243_v56, 4 }
 0x2aa   : >> { %v245_v58 = vadd.s32 %v244_v57, %v243_v56 }
 0x2ac   : >> { %v246_v59 = vrot.slane %v245_v58, 2 }
 0x2ae   : >> { %v247_v60 = vadd.s32 %v246_v59, %v245_v58 }
 0x2b0   : >> { %v248_v61 = vrot.slane %v247_v60, 1 }
 0x2b2   : >> { %v249_v62 = vadd.s32 %v248_v61, %v247_v60 }
 0x2b4   : >> { %393 = vpush %v249_v62 }
 0x2e5   : >> { %s394_s8 = spop %393  ;;  %216 = sbr.rel (!%p214_p4) target bundleno = 515 (0x203), region = 94 }
 0x2e6   : >> { %p251_p10 = scmp.ge.s32.totalorder %s394_s8, %s829_s26  ;;  %s523_s26 = scalar_lea.vmem (%p214_p4), %s886_s17, 128 }
 0x2e7   : > { %p524_p8 = scmp.ne.s32.totalorder (%p214_p4), %s886_s17, %s523_s26 }
 0x2e8   : >> { %s253_s10 = scalar_select %p251_p10, %s633_s28, %s252_s9 }
 0x2e9   : >> { %s962_s7 = smov (!%p251_p10, %s849_s7), %s629_s27  ;;  %p525_p0 = pnand (%p214_p4), %p524_p8, %p944_p9 }
 0x2ea   : >> { %s964_s10 = smov (!%p255_p2, %s253_s10), %s633_s28  ;;  %s966_s7 = smov (!%p255_p2, %s962_s7), %s629_s27 }
 0x2eb   : >> { %s942_s27 = smov %s966_s7  ;;  %s943_s28 = smov %s964_s10 }
 0x2ec   : > { %s968_s10 = smov (!%p258_p5, %s964_s10), 4294967295  ;;  %p526_p1 = pneg %p525_p0 }
 0x2ed   : > { %v261_v63 = vstv %s968_s10  ;;  %s644_s27 = smov [#allocation7]  }
 0x2ee   : > { %vm262_vm6 = vcmp.gt.s32.totalorder %v778_v4, %v261_v63  ;;  %s527_s28 = sshll.u32 %s644_s27, 4  ;;  %s528_s28 = int_to_ptr.vmem [resolvable:$false] %s527_s28 }
 0x2ef   : > { %vm263_vm7 = vmand %vm211_vm2, %vm262_vm6  ;;  %s529_s3 = scalar_lea.vmem %s528_s28, 256  ;;  %p530_p3 = scmp.lt.s32.totalorder %s886_s17, %s528_s28 }
 0x2f0   : > { %vm264_vm8 = vmor %vm260_vm5, %vm263_vm7  ;;  %p531_p6 = scmp.lt.s32.totalorder %s529_s3, %s523_s26 }
 0x2f1   : > { %v384_v1 = vsel %vm264_vm8, 1.0, %v643_v0 }
 0x2f2   : > { %267 = vst [vmem:[%s782_s30] sm:$0xff] %v384_v1  ;;  %p532_p11 = por %p531_p6, %p530_p3 }
 0x2f4   : > { %p533_p12 = pnand %p532_p11, %p526_p1 }
 0x2f6   : > { %536 = shalt.err (!%p533_p12)
}
 0x2f7   : > { %s537_s25 = scalar_lea.hbm %s884_s24, 128  ;;  %s541_s4 = scalar_lea.hbm %s931_s2, 256 }
 0x2f8   : > { %p538_p13 = scmp.ne.s32.totalorder %s884_s24, %s537_s25  ;;  %p542_p2 = scmp.lt.u32.totalorder %s884_s24, %s931_s2 }
 0x2f9   : > { %p543_p4 = scmp.lt.u32.totalorder %s541_s4, %s537_s25  ;;  %p545_p8 = scmp.lt.u32.totalorder %s537_s25, %s884_s24 }
 0x2fa   : > { %p539_p7 = pnand %p538_p13, %p944_p9 }
 0x2fb   : > { %p544_p5 = por %p543_p4, %p542_p2 }
 0x2fc   : > { %p540_p10 = pneg %p539_p7 }
 0x2fd   : > { %p546_p0 = por %p545_p8, %p544_p5 }
 0x2ff   : > { %p547_p1 = pnand %p546_p0, %p540_p10 }
 0x301   : > { %550 = shalt.err (!%p547_p1)
}
 0x302   : > { %397 = dma.vmem_to_hbm [thread:$0]  (%p944_p9), %s886_s17, 128, %s884_s24, %s269_s0  }
 0x303 PF: > { %s294_s6 = sand.u32 1, %s601_s11   ;;  %p945_p3 = scmp.ne.s32.totalorder %s936_s23, 0 }
 0x304   : > { %p946_p6 = scmp.ge.s32.totalorder %s613_s14, 2  ;;  %s295_s7 = scalar_lea.sflag [#allocation6], %s294_s6 }
 0x306   : > { %p404_p11 = pnand %p946_p6, %p945_p3 }
 0x308   : > { %596 = dma.done.wait (!%p404_p11), %s295_s7, 128  }
 0x309   : > { %598 = vsyncadd (!%p404_p11), %s295_s7, 4294967168  ;;  %p16_p12 = scmp.ge.s32.totalorder %s688_s16, 4   ;;  %s947_s11 = smov %s605_s12 }
 0x30a   : > { %s948_s12 = smov %s609_s13  ;;  %s949_s13 = smov %s700_s19 }
 0x30b   : > { %s950_s14 = smov %s688_s16  ;;  %18 = sbr.rel (!%p16_p12) target bundleno = 7 (0x7), region = 105 }
 0x312   :  { %300 = vsyncpa [#allocation5], 1 }
 0x313   :  { %302 = vsyncpa [#allocation5 + $0x1], 1 }
 0x314   :  { %303 = vsyncpa [#allocation6], 1 }
 0x315   :  { %305 = vsyncpa [#allocation6 + $0x1], 1 }

</bundles_post_ra>
